<compile_context>
chip_gen: v7x
topology: tpu7x:2x2x1
jax: 0.10.0
libtpu: 0.0.40
codegen_flags: <defaults>
</compile_context>

<pallas_src>
import functools

import jax
import jax.numpy as jnp
from jax import lax
from jax.experimental import pallas as pl
from jax.experimental.pallas import tpu as pltpu

LANE = 128          # lane width (last dim of every block)
SUB_ROWS = 256      # rows per in-register sub-chunk inside a block
PAD_LOGIT = -1e4    # neutral pad logit: with target=0 the BCE term is exactly 0
                    # (safe/finite in f16/bf16/f32; exp(-|x|) underflows to 0)


def _cdiv(a, b):
    return -(-a // b)


def _round_up(a, b):
    return _cdiv(a, b) * b


def _round_down(a, b):
    return (a // b) * b


def _tpu_tuning():
    """(num_partials, tm_max) picked from the local TPU generation."""
    kind = ""
    try:
        kind = jax.devices()[0].device_kind.lower()
    except Exception:
        pass
    # Multi-TensorCore-per-device parts benefit from a size-2 "parallel" axis.
    multi_tc = any(tag in kind for tag in ("v4", "v5p", "v7", "tpu7"))
    # v7x: ~3.2 TB/s per TC -> bigger blocks to amortize per-step overhead.
    tm_max = 8192 if ("v7" in kind or "tpu7" in kind) else 4096
    return (2 if multi_tc else 1), tm_max


def _focal_sum_kernel(x_ref, t_ref, o_ref, *, total_rows, tm, sub_rows):
    """Accumulate per-lane partial sums of BCE-with-logits into o_ref (8,128)."""
    p = pl.program_id(0)
    k = pl.program_id(1)
    steps = pl.num_programs(1)

    @pl.when(k == 0)
    def _():
        o_ref[...] = jnp.zeros_like(o_ref)

    # Logical block id / first global row of this block.  Row indices (not
    # flat element indices) keep int32 safe for any realistic input size.
    blk = p * steps + k
    row0 = blk * tm
    nsub = tm // sub_rows

    def bce(x, t):
        x = x.astype(jnp.float32)
        t = t.astype(jnp.float32)
        # Numerically stable BCE-with-logits elementwise term (matches
        # torch.nn.BCEWithLogitsLoss): max(x,0) - x*t + log(1 + exp(-|x|))
        return jnp.maximum(x, 0.0) - x * t + jnp.log1p(jnp.exp(-jnp.abs(x)))

    def fold(z, acc):
        # (SUB,128) -> (SUB//8, 8, 128), sum over the leading axis:
        # tile-aligned pure-VPU adds into a single-vreg carry.
        return acc + jnp.sum(z.reshape(sub_rows // 8, 8, LANE), axis=0)

    is_full = row0 + tm <= total_rows

    # Fast path: every row of the block is valid -> no masking at all.
    @pl.when(is_full)
    def _():
        def body(s, acc):
            r = pl.multiple_of(s * sub_rows, sub_rows)
            z = bce(x_ref[pl.ds(r, sub_rows), :], t_ref[pl.ds(r, sub_rows), :])
            return fold(z, acc)

        o_ref[...] += lax.fori_loop(0, nsub, body,
                                    jnp.zeros((8, LANE), jnp.float32))

    # Slow path (only the final / duplicate blocks): mask overhang rows by
    # their global row index; out-of-bounds (garbage) rows contribute 0.
    @pl.when(jnp.logical_not(is_full))
    def _():
        def body(s, acc):
            r = pl.multiple_of(s * sub_rows, sub_rows)
            z = bce(x_ref[pl.ds(r, sub_rows), :], t_ref[pl.ds(r, sub_rows), :])
            gr = row0 + r + lax.broadcasted_iota(jnp.int32, z.shape, 0)
            return fold(jnp.where(gr < total_rows, z, 0.0), acc)

        o_ref[...] += lax.fori_loop(0, nsub, body,
                                    jnp.zeros((8, LANE), jnp.float32))


def focal_loss(output, target, gamma=2.0, alpha=0.5, size_average=True):
    # output: [N, 1, H, W] logits ; target: [N, H, W]
    x = jnp.squeeze(output, axis=1)
    if not jnp.issubdtype(x.dtype, jnp.floating):
        x = x.astype(jnp.float32)
    t = target
    if not jnp.issubdtype(t.dtype, jnp.floating):
        t = t.astype(jnp.float32)   # matches target.float(); {0,1} is exact
    # NOTE: a floating target is streamed in its native dtype.  Casting
    # f32->bf16 in the wrapper would risk an extra full HBM pass unless XLA
    # fuses it, so we deliberately do not.

    n = x.size
    num_partials, tm_max = _tpu_tuning()

    rows = _cdiv(n, LANE)
    rows_padded = max(rows, 8)          # at least one (8,128) tile of rows
    n_padded = rows_padded * LANE

    xf = x.reshape(-1)
    tf = t.reshape(-1)
    if n_padded != n:
        # Only for lane-unaligned or tiny (<1024 element) inputs (at most a
        # few KiB).  Pad values are chosen so their BCE term is exactly 0
        # (logit=-1e4, target=0); no masking needed for the padded region.
        xf = jnp.pad(xf, (0, n_padded - n), constant_values=PAD_LOGIT)
        tf = jnp.pad(tf, (0, n_padded - n))
    xf = xf.reshape(rows_padded, LANE)   # contiguous reshape: free
    tf = tf.reshape(rows_padded, LANE)

    # Block rows: multiple of SUB_ROWS when large (in-register sub-chunks),
    # multiple of 8 otherwise; never larger than the array, capped per-gen.
    tm = _cdiv(rows_padded, num_partials)
    tm = _round_up(tm, SUB_ROWS) if tm >= SUB_ROWS else _round_up(tm, 8)
    tm = min(tm, tm_max, _round_down(rows_padded, 8))
    sub_rows = SUB_ROWS if tm % SUB_ROWS == 0 else tm

    num_blocks = _cdiv(rows_padded, tm)            # blocks holding real rows
    steps = _cdiv(num_blocks, num_partials)        # reduction steps / partial

    def in_index(p, k):
        # Clamp so every DMA stays in bounds; duplicate blocks (grid slots
        # beyond num_blocks) are fully masked inside the kernel.
        return (jnp.minimum(p * steps + k, num_blocks - 1), 0)

    kernel = functools.partial(
        _focal_sum_kernel, total_rows=rows_padded, tm=tm, sub_rows=sub_rows)

    partials = pl.pallas_call(
        kernel,
        out_shape=jax.ShapeDtypeStruct((num_partials * 8, LANE), jnp.float32),
        grid=(num_partials, steps),
        in_specs=[
            pl.BlockSpec((tm, LANE), in_index),
            pl.BlockSpec((tm, LANE), in_index),
        ],
        out_specs=pl.BlockSpec((8, LANE), lambda p, k: (p, 0)),
        compiler_params=pltpu.CompilerParams(
            dimension_semantics=("parallel", "arbitrary"),
            # Let XLA fuse the (rare) pad / reshape producers straight into
            # the pallas operands instead of materializing copies in HBM.
            allow_input_fusion=[True, True],
            vmem_limit_bytes=32 * 1024 * 1024,
        ),
    )(xf, tf)

    # Final (tiny) reduction + focal transform: scalar-cheap, done in XLA.
    total = jnp.sum(partials)
    logpt = total / jnp.float32(n)          # BCEWithLogitsLoss mean reduction
    pt = jnp.exp(-logpt)
    if gamma == 2:
        focal_w = (1.0 - pt) * (1.0 - pt)   # avoid float pow for the default
    else:
        focal_w = (1.0 - pt) ** gamma
    loss = focal_w * logpt * alpha
    # size_average: mean vs sum of a scalar is identical -> scalar result.
    return loss


def _reference(output, target, gamma=2.0, alpha=0.5):
    x = jnp.squeeze(output, axis=1).astype(jnp.float32)
    t = target.astype(jnp.float32)
    bce = jnp.maximum(x, 0.0) - x * t + jnp.log1p(jnp.exp(-jnp.abs(x)))
    logpt = jnp.mean(bce)
    pt = jnp.exp(-logpt)
    return ((1.0 - pt) ** gamma) * logpt * alpha


if __name__ == "__main__":
    key = jax.random.PRNGKey(0)
    k1, k2, k3, k4 = jax.random.split(key, 4)

    loss_fn = jax.jit(
        functools.partial(focal_loss, gamma=2.0, alpha=0.5, size_average=True)
    )

    # 1) Small NCHW shape consistent with the module (C must be 1).
    logits = jax.random.normal(k1, (2, 1, 16, 16), dtype=jnp.float32)
    target = (jax.random.uniform(k2, (2, 16, 16)) > 0.5).astype(jnp.float32)
    loss = jax.block_until_ready(loss_fn(logits, target))
    ref = jax.block_until_ready(_reference(logits, target))
    assert jnp.allclose(loss, ref, rtol=1e-5, atol=1e-6), (loss, ref)

    # 2) Lane-unaligned shape: exercises the neutral-pad path.
    logits2 = jax.random.normal(k3, (3, 1, 17, 19), dtype=jnp.float32)
    target2 = (jax.random.uniform(k4, (3, 17, 19)) > 0.5).astype(jnp.float32)
    loss2 = jax.block_until_ready(loss_fn(logits2, target2))
    ref2 = jax.block_until_ready(_reference(logits2, target2))
    assert jnp.allclose(loss2, ref2, rtol=1e-5, atol=1e-6), (loss2, ref2)

    print("KERNEL_OK")
</pallas_src>

<mosaic_0001>
module attributes {stable_mosaic.version = 11 : i64} {
  func.func @_focal_sum_kernel(%arg0: i32, %arg1: i32, %arg2: memref<8x128xf32, #tpu.memory_space<vmem>>, %arg3: memref<8x128xf32, #tpu.memory_space<vmem>>, %arg4: memref<8x128xf32, #tpu.memory_space<vmem>>) attributes {dimension_semantics = [#tpu.dimension_semantics<parallel>, #tpu.dimension_semantics<arbitrary>], iteration_bounds = array<i64: 1, 1>, scalar_prefetch = 0 : i64, scratch_operands = 0 : i64, tpu.core_type = #tpu.core_type<tc>, window_params = [{transform_indices = @transform_0, window_bounds = array<i64: 8, 128>}, {transform_indices = @transform_1, window_bounds = array<i64: 8, 128>}, {transform_indices = @transform_2, window_bounds = array<i64: 8, 128>}]} {
    %c0_i32 = arith.constant 0 : i32
    %0 = arith.cmpi eq, %arg1, %c0_i32 : i32
    %1 = arith.extui %0 : i1 to i32
    %c0_i32_0 = arith.constant 0 : i32
    %2 = arith.cmpi ne, %1, %c0_i32_0 : i32
    scf.if %2 {
      %cst = arith.constant 0.000000e+00 : f32
      %13 = vector.broadcast %cst : f32 to vector<8x128xf32>
      %c0 = arith.constant 0 : index
      %c0_5 = arith.constant 0 : index
      %14 = vector.load %arg4[%c0, %c0_5] : memref<8x128xf32, #tpu.memory_space<vmem>>, vector<8x128xf32>
      tpu.vector_store %arg4[%c0, %c0_5], %13 {strides = array<i32>} : memref<8x128xf32, #tpu.memory_space<vmem>>, vector<8x128xf32>,
    } else {
    }
    %c1_i32 = arith.constant 1 : i32
    %3 = arith.muli %arg0, %c1_i32 : i32
    %4 = arith.addi %3, %arg1 : i32
    %c8_i32 = arith.constant 8 : i32
    %5 = arith.muli %4, %c8_i32 : i32
    %c8_i32_1 = arith.constant 8 : i32
    %6 = arith.addi %5, %c8_i32_1 : i32
    %c8_i32_2 = arith.constant 8 : i32
    %7 = arith.cmpi sle, %6, %c8_i32_2 : i32
    %8 = arith.extui %7 : i1 to i32
    %c0_i32_3 = arith.constant 0 : i32
    %9 = arith.cmpi ne, %8, %c0_i32_3 : i32
    scf.if %9 {
      %c0 = arith.constant 0 : index
      %c0_5 = arith.constant 0 : index
      %13 = vector.load %arg4[%c0, %c0_5] : memref<8x128xf32, #tpu.memory_space<vmem>>, vector<8x128xf32>
      %cst = arith.constant 0.000000e+00 : f32
      %14 = vector.broadcast %cst : f32 to vector<8x128xf32>
      %c0_i32_6 = arith.constant 0 : i32
      %c8_i32_7 = arith.constant 8 : i32
      %15 = arith.muli %c0_i32_6, %c8_i32_7 : i32
      %16 = tpu.assume_multiple %15, 8 : i32
      %17 = arith.index_cast %16 : i32 to index
      %c0_8 = arith.constant 0 : index
      %18 = vector.load %arg2[%17, %c0_8] : memref<8x128xf32, #tpu.memory_space<vmem>>, vector<8x128xf32>
      %19 = arith.index_cast %16 : i32 to index
      %c0_9 = arith.constant 0 : index
      %20 = vector.load %arg3[%19, %c0_9] : memref<8x128xf32, #tpu.memory_space<vmem>>, vector<8x128xf32>
      %cst_10 = arith.constant 0.000000e+00 : f32
      %21 = vector.broadcast %cst_10 : f32 to vector<8x128xf32>
      %22 = arith.maximumf %18, %21 : vector<8x128xf32>
      %23 = arith.mulf %18, %20 : vector<8x128xf32>
      %24 = arith.subf %22, %23 : vector<8x128xf32>
      %25 = math.absf %18 : vector<8x128xf32>
      %cst_11 = arith.constant 0.000000e+00 : f32
      %26 = vector.broadcast %cst_11 : f32 to vector<8x128xf32>
      %27 = arith.subf %26, %25 : vector<8x128xf32>
      %28 = math.exp %27 : vector<8x128xf32>
      %29 = math.log1p %28 : vector<8x128xf32>
      %30 = arith.addf %24, %29 : vector<8x128xf32>
      %31 = vector.shape_cast %30 : vector<8x128xf32> to vector<1x8x128xf32>
      %cst_12 = arith.constant dense<0.000000e+00> : vector<8x128xf32>
      %32 = vector.multi_reduction <add>, %31, %cst_12 [0] : vector<1x8x128xf32> to vector<8x128xf32>
      %33 = arith.addf %14, %32 : vector<8x128xf32>
      %c1_i32_13 = arith.constant 1 : i32
      %34 = arith.addf %13, %33 : vector<8x128xf32>
      %c0_14 = arith.constant 0 : index
      %c0_15 = arith.constant 0 : index
      %35 = vector.load %arg4[%c0_14, %c0_15] : memref<8x128xf32, #tpu.memory_space<vmem>>, vector<8x128xf32>
      tpu.vector_store %arg4[%c0_14, %c0_15], %34 {strides = array<i32>} : memref<8x128xf32, #tpu.memory_space<vmem>>, vector<8x128xf32>,
    } else {
    }
    %true = arith.constant true
    %10 = arith.xori %7, %true : i1
    %11 = arith.extui %10 : i1 to i32
    %c0_i32_4 = arith.constant 0 : i32
    %12 = arith.cmpi ne, %11, %c0_i32_4 : i32
    scf.if %12 {
      %c0 = arith.constant 0 : index
      %c0_5 = arith.constant 0 : index
      %13 = vector.load %arg4[%c0, %c0_5] : memref<8x128xf32, #tpu.memory_space<vmem>>, vector<8x128xf32>
      %cst = arith.constant 0.000000e+00 : f32
      %14 = vector.broadcast %cst : f32 to vector<8x128xf32>
      %c0_i32_6 = arith.constant 0 : i32
      %c8_i32_7 = arith.constant 8 : i32
      %15 = arith.muli %c0_i32_6, %c8_i32_7 : i32
      %16 = tpu.assume_multiple %15, 8 : i32
      %17 = arith.index_cast %16 : i32 to index
      %c0_8 = arith.constant 0 : index
      %18 = vector.load %arg2[%17, %c0_8] : memref<8x128xf32, #tpu.memory_space<vmem>>, vector<8x128xf32>
      %19 = arith.index_cast %16 : i32 to index
      %c0_9 = arith.constant 0 : index
      %20 = vector.load %arg3[%19, %c0_9] : memref<8x128xf32, #tpu.memory_space<vmem>>, vector<8x128xf32>
      %cst_10 = arith.constant 0.000000e+00 : f32
      %21 = vector.broadcast %cst_10 : f32 to vector<8x128xf32>
      %22 = arith.maximumf %18, %21 : vector<8x128xf32>
      %23 = arith.mulf %18, %20 : vector<8x128xf32>
      %24 = arith.subf %22, %23 : vector<8x128xf32>
      %25 = math.absf %18 : vector<8x128xf32>
      %cst_11 = arith.constant 0.000000e+00 : f32
      %26 = vector.broadcast %cst_11 : f32 to vector<8x128xf32>
      %27 = arith.subf %26, %25 : vector<8x128xf32>
      %28 = math.exp %27 : vector<8x128xf32>
      %29 = math.log1p %28 : vector<8x128xf32>
      %30 = arith.addf %24, %29 : vector<8x128xf32>
      %31 = arith.addi %5, %16 : i32
      %32 = tpu.iota {dimensions = array<i32: 0>} : vector<8x128xi32>
      %33 = vector.broadcast %31 : i32 to vector<8x128xi32>
      %34 = arith.addi %33, %32 : vector<8x128xi32>
      %c8_i32_12 = arith.constant 8 : i32
      %35 = vector.broadcast %c8_i32_12 : i32 to vector<8x128xi32>
      %36 = arith.cmpi slt, %34, %35 : vector<8x128xi32>
      %cst_13 = arith.constant 0.000000e+00 : f32
      %37 = vector.broadcast %cst_13 : f32 to vector<8x128xf32>
      %38 = arith.select %36, %30, %37 : vector<8x128xi1>, vector<8x128xf32>
      %39 = vector.shape_cast %38 : vector<8x128xf32> to vector<1x8x128xf32>
      %cst_14 = arith.constant dense<0.000000e+00> : vector<8x128xf32>
      %40 = vector.multi_reduction <add>, %39, %cst_14 [0] : vector<1x8x128xf32> to vector<8x128xf32>
      %41 = arith.addf %14, %40 : vector<8x128xf32>
      %c1_i32_15 = arith.constant 1 : i32
      %42 = arith.addf %13, %41 : vector<8x128xf32>
      %c0_16 = arith.constant 0 : index
      %c0_17 = arith.constant 0 : index
      %43 = vector.load %arg4[%c0_16, %c0_17] : memref<8x128xf32, #tpu.memory_space<vmem>>, vector<8x128xf32>
      tpu.vector_store %arg4[%c0_16, %c0_17], %42 {strides = array<i32>} : memref<8x128xf32, #tpu.memory_space<vmem>>, vector<8x128xf32>,
    } else {
    }
    return
  }
  func.func @transform_0(%arg0: i32, %arg1: i32) -> (i32, i32) {
    %c1_i32 = arith.constant 1 : i32
    %0 = arith.muli %arg0, %c1_i32 : i32
    %1 = arith.addi %0, %arg1 : i32
    %c0_i32 = arith.constant 0 : i32
    %2 = arith.minsi %1, %c0_i32 : i32
    %c0_i32_0 = arith.constant 0 : i32
    %c0_i32_1 = arith.constant 0 : i32
    return %2, %c0_i32_0 : i32, i32
  }
  func.func @transform_1(%arg0: i32, %arg1: i32) -> (i32, i32) {
    %c1_i32 = arith.constant 1 : i32
    %0 = arith.muli %arg0, %c1_i32 : i32
    %1 = arith.addi %0, %arg1 : i32
    %c0_i32 = arith.constant 0 : i32
    %2 = arith.minsi %1, %c0_i32 : i32
    %c0_i32_0 = arith.constant 0 : i32
    %c0_i32_1 = arith.constant 0 : i32
    return %2, %c0_i32_0 : i32, i32
  }
  func.func @transform_2(%arg0: i32, %arg1: i32) -> (i32, i32) {
    %c0_i32 = arith.constant 0 : i32
    %c0_i32_0 = arith.constant 0 : i32
    return %arg0, %c0_i32 : i32, i32
  }
}

</mosaic_0001>

<bundles_post_ra>
// kernel: squeeze.1
= control target key start
LH: loop header
LB: loop body
LE: loop exit
PB: predicated region body
PF: predicated region fallthrough
CT: control target
= control target key end

     0   :  { %2 = vsyncpa [#allocation1], 0  ;;  %s96_s6 = smov [#allocation0]   ;;  %s129_s0 = inlined_call_operand.hbm [shape: f32[2,1,16,16], index: 0, kind: input, shape index: {}]   ;;  %s130_s1 = inlined_call_operand.vmem [shape: f32[512], index: 1, kind: output, shape index: {}]  }
   0x1   :  { %s7_s7 = sshll.u32 %s96_s6, 4  ;;  %s72_s10 = scalar_lea.hbm %s129_s0, 512  ;;  %s8_s7 = int_to_ptr.vmem [resolvable:$true] %s7_s7 }
   0x2   :  { %p73_p0 = scmp.ne.s32.totalorder %s129_s0, %s72_s10  ;;  %p76_p1 = scmp.lt.u32.totalorder %s72_s10, %s129_s0 }
   0x4   :  { %p78_p2 = pnand %p76_p1, %p73_p0 }
   0x6   :  { %81 = shalt.err (!%p78_p2)
}
   0x7   :  { %s82_s15 = scalar_lea.vmem %s8_s7, 512  ;;  %p87_p4 = scmp.lt.s32.totalorder %s8_s7, %s8_s7 }
   0x8   :  { %p83_p3 = scmp.ne.s32.totalorder %s8_s7, %s82_s15  ;;  %p88_p5 = scmp.lt.s32.totalorder %s82_s15, %s82_s15 }
   0xa   :  { %p89_p6 = por %p88_p5, %p87_p4 }
   0xc   :  { %p90_p7 = pnand %p89_p6, %p83_p3 }
   0xe   :  { %93 = shalt.err (!%p90_p7)
}
   0xf   :  { %10 = dma.hbm_to_vmem [thread:$0]  %s129_s0, 512, %s8_s7, [#allocation1]  }
  0x10   :  { %94 = dma.done.wait [#allocation1], 512  }
  0x11   :  { %95 = vsyncadd [#allocation1], 4294966784  ;;  %v16_v0 = vld [vmem:[#allocation0 + $0x7] ss:$8 sm:$0xf]   ;;  %s97_s0 = smov 112  }
  0x12   :  { %v28_v1 = vld [vmem:[#allocation0 + $0x5] ss:$8 sm:$0xf]   ;;  %17 = vrot.lane.b32.xlu0 %v16_v0, %s97_s0  ;;  %s98_s18 = smov 80   ;;  %vm13_vm0 = vcmask 130048   ;;  %s99_s19 = smov 96  }
  0x13   :  { %29 = vrot.lane.b32.xlu1 %v28_v1, %s98_s18  ;;  %v22_v2 = vld [vmem:[#allocation0 + $0x6] ss:$8 sm:$0xf]   ;;  %v34_v3 = vld [vmem:[#allocation0 + $0x4] ss:$8 sm:$0xf]  }
  0x14   :  { %v12_v4 = vld [vmem:[#allocation0] ss:$8 sm:$0xf]   ;;  %s100_s20 = smov 64   ;;  %s101_s21 = smov 48   ;;  %vm19_vm1 = vcmask 1048448  }
  0x15   :  { %14 = vst.msk [vmem:[#allocation2] sm:$0xf] %vm13_vm0, %v12_v4   ;;  %v40_v5 = vld [vmem:[#allocation0 + $0x3] ss:$8 sm:$0xf]   ;;  %s102_s22 = smov 32  }
  0x16   :  { %23 = vrot.lane.b32.xlu0 %v22_v2, %s99_s19  ;;  %v46_v6 = vld [vmem:[#allocation0 + $0x2] ss:$8 sm:$0xf]   ;;  %v52_v7 = vld [vmem:[#allocation0 + $0x1] ss:$8 sm:$0xf]  }
  0x17   :  { %35 = vrot.lane.b32.xlu1 %v34_v3, %s100_s20  ;;  %s103_s23 = smov 16   ;;  %vm25_vm2 = vcmask 917248   ;;  %vm31_vm3 = vcmask 786048   ;;  %vm37_vm4 = vcmask 654848   ;;  %vm43_vm5 = vcmask 523648  }
  0x18   :  { %vm49_vm6 = vcmask 392448   ;;  %vm55_vm7 = vcmask 261248  }
  0x1a   :  { %41 = vrot.lane.b32.xlu0 %v40_v5, %s101_s21 }
  0x1b   :  { %47 = vrot.lane.b32.xlu1 %v46_v6, %s102_s22 }
  0x1e   :  { %53 = vrot.lane.b32.xlu0 %v52_v7, %s103_s23 }
  0x84   :  { %v18_v8 = vpop.permute.xlu0 %17  }
  0x85   :  { %v30_v9 = vpop.permute.xlu1 %29   ;;  %20 = vst.msk [vmem:[#allocation2] sm:$0xf] %vm19_vm1, %v18_v8  }
  0x88   :  { %v24_v10 = vpop.permute.xlu0 %23  }
  0x89   :  { %v36_v11 = vpop.permute.xlu1 %35   ;;  %26 = vst.msk [vmem:[#allocation2] sm:$0xf] %vm25_vm2, %v24_v10  }
  0x8a   :  { %32 = vst.msk [vmem:[#allocation2] sm:$0xf] %vm31_vm3, %v30_v9  }
  0x8b   :  { %38 = vst.msk [vmem:[#allocation2] sm:$0xf] %vm37_vm4, %v36_v11  }
  0x8c   :  { %v42_v12 = vpop.permute.xlu0 %41  }
  0x8d   :  { %v48_v13 = vpop.permute.xlu1 %47   ;;  %44 = vst.msk [vmem:[#allocation2] sm:$0xf] %vm43_vm5, %v42_v12  }
  0x8e   :  { %50 = vst.msk [vmem:[#allocation2] sm:$0xf] %vm49_vm6, %v48_v13  }
  0x90   :  { %v54_v14 = vpop.permute.xlu0 %53  }
  0x91   :  { %56 = vst.msk [vmem:[#allocation2] sm:$0xf] %vm55_vm7, %v54_v14  }
  0x98   :  { %v60_v15 = vld [vmem:[#allocation2] sm:$0xf] }
  0x99   :  { %62 = vst [vmem:[%s130_s1] sm:$0xf] %v60_v15 }
  0x9a   :  { %63 = vsyncpa [#allocation1], 1 }

// kernel: focal_loss.2
= control target key start
LH: loop header
LB: loop body
LE: loop exit
PB: predicated region body
PF: predicated region fallthrough
CT: control target
= control target key end

     0   :  { %v245_v2 = vmov 0.0   ;;  %v229_v3 = vlaneseq  ;;  %s292_s0 = inlined_call_operand.vmem [shape: f32[512], index: 0, kind: input, shape index: {}]   ;;  %s293_s1 = inlined_call_operand.<no memory space> [shape: f32[], index: 1, kind: input, shape index: {}]   ;;  %s294_s2 = inlined_call_operand.vmem [shape: f32[512], index: 2, kind: input, shape index: {}]   ;;  %s295_s3 = inlined_call_operand.<no memory space> [shape: f32[], index: 3, kind: input, shape index: {}]   ;;  %s296_s4 = inlined_call_operand.vmem [shape: f32[8,128], index: 4, kind: output, shape index: {}]  }
   0x1   :  { %v9_v0 = vstv %s295_s3  ;;  %v10_v1 = vstv %s293_s1  ;;  %129 = vst [vmem:[%s296_s4] sm:$0xff] %v245_v2  ;;  %v212_v4 = vld [vmem:[%s294_s2] sm:$0xf] }
   0x2   :  { %vm230_vm0 = vcmp.lt.s32.totalorder %v229_v3, 512  ;;  %v226_v11 = vld [vmem:[%s292_s0] sm:$0xf] }
   0x3   :  { %v217_v5 = vsel %vm230_vm0, %v212_v4, %v9_v0  ;;  %v231_v13 = vsel %vm230_vm0, %v226_v11, %v10_v1 }
   0x4   :  { %v143_v6 = vand.u32 2147483647, %v217_v5  ;;  %v140_v15 = vmax.f32 %v217_v5, 0.0  ;;  %v141_v16 = vmul.f32 %v231_v13, %v217_v5 }
   0x6   :  { %v144_v7 = vsub.f32 0.0, %v143_v6  ;;  %v142_v20 = vsub.f32 %v140_v15, %v141_v16 }
   0x8   :  { %v145_v8 = vmul.f32 1.442695, %v144_v7  ;;  %v137_v22 = vld [vmem:[%s296_s4] sm:$0xff] }
   0xa   :  { %241 = vpow2.f32 %v145_v8 }
  0x14   :  { %v242_v9 = vpop.eup %241 }
  0x15   :  { %v147_v10 = vadd.f32 1.0, %v242_v9  ;;  %v150_v12 = vmul.f32 -0.5, %v242_v9  ;;  %v153_v17 = vand.u32 2147483647, %v242_v9 }
  0x17   :  { %243 = vlog2.f32 %v147_v10  ;;  %v151_v14 = vadd.f32 1.0, %v150_v12  ;;  %vm154_vm1 = vcmp.lt.f32.partialorder %v153_v17, 0.0004427343 }
  0x19   :  { %v152_v18 = vmul.f32 %v242_v9, %v151_v14 }
  0x21   :  { %v244_v19 = vpop.eup %243 }
  0x22   :  { %v149_v21 = vmul.f32 0.6931472, %v244_v19 }
  0x24   :  { %v155_v23 = vsel %vm154_vm1, %v152_v18, %v149_v21 }
  0x25   :  { %v156_v24 = vadd.f32 %v155_v23, %v142_v20 }
  0x27   :  { %v159_v25 = vadd.f32 %v156_v24, %v137_v22 }
  0x29   :  { %160 = vst [vmem:[%s296_s4] sm:$0xff] %v159_v25 }

</bundles_post_ra>
